<compile_context>
chip_gen: v6e
topology: v6e:2x2x1
jax: 0.10.0
libtpu: 0.0.40
codegen_flags: <defaults>
</compile_context>

<pallas_src>
import jax
import jax.numpy as jnp
from jax import lax
from jax.experimental import pallas as pl
from jax.experimental.pallas import tpu as pltpu

# Finite (not -inf) so exp(m_old - m_new) stays NaN-free at init / under masking.
_NEG = float(jnp.finfo(jnp.float32).min)


def _round_up(v, m):
    return (v + m - 1) // m * m


def _make_kernel(batch, tile_b, num_tiles):
    """Kernel factory closing over static Python scalars only."""
    mask_needed = (batch % tile_b) != 0
    valid_last = batch - (num_tiles - 1) * tile_b   # valid cols in last tile

    def kernel(x_ref, w1_ref, b1_ref, w2_ref, b2_ref, w3_ref, b3_ref,
               o_ref, e_scr, mh_scr, m_scr, l_scr):
        p = pl.program_id(0)   # 0: reduction pass, 1: normalize/project pass
        i = pl.program_id(1)   # batch-tile index

        @pl.when(p == 0)
        def _reduce_pass():
            @pl.when(i == 0)
            def _init():
                m_scr[...] = jnp.full(m_scr.shape, _NEG, m_scr.dtype)
                l_scr[...] = jnp.zeros(l_scr.shape, l_scr.dtype)

            # BaseModel trunk, feature-major on the MXU: contract x's feature
            # (last) dim directly -> (200, TB); no wrapper transpose of x.
            h = lax.dot_general(w1_ref[...], x_ref[...],
                                dimension_numbers=(((1,), (1,)), ((), ())),
                                preferred_element_type=jnp.float32) + b1_ref[...]
            h = jnp.maximum(h, 0.0)                                   # ReLU
            z = jnp.dot(w2_ref[...], h,
                        preferred_element_type=jnp.float32) + b2_ref[...]

            def accumulate(zt):
                # Online (flash-style) max / sum-exp over the batch (lane) axis.
                # Stage exp(zt - m_new) so pass 1 needs no second exp.
                m_old = m_scr[...]
                m_new = jnp.maximum(m_old, jnp.max(zt, axis=1, keepdims=True))
                e = jnp.exp(zt - m_new)
                e_scr[i] = e
                mh_scr[i] = m_new
                l_scr[...] = (jnp.exp(m_old - m_new) * l_scr[...]
                              + jnp.sum(e, axis=1, keepdims=True))
                m_scr[...] = m_new

            if mask_needed:
                # Only the last tile can contain padded batch columns; mask is
                # applied before exp/sum AND before staging.
                @pl.when(i != num_tiles - 1)
                def _():
                    accumulate(z)

                @pl.when(i == num_tiles - 1)
                def _():
                    col = lax.broadcasted_iota(jnp.int32, z.shape, 1)
                    accumulate(jnp.where(col < valid_last, z, _NEG))
            else:
                accumulate(z)

        @pl.when(p == 1)
        def _project_pass():
            e = e_scr[i]
            # softmax(z) column = e * exp(m_i - m_final) / l_final
            scale = jnp.exp(mh_scr[i] - m_scr[...]) / l_scr[...]     # (10, 1)
            s = e * scale
            # NestedModel tail: Linear(10,20) + ReLU.
            y = jnp.dot(w3_ref[...], s,
                        preferred_element_type=jnp.float32) + b3_ref[...]
            o_ref[...] = jnp.maximum(y, 0.0)     # lane-dense (20, TB) store

    return kernel


def _vmem_limit_bytes(nt, tb, x_itemsize):
    # staged exp tiles (10 rows pad to 16 sublanes) + x/out double buffers
    # + weights + headroom; clamp to ~85% of this generation's VMEM capacity.
    need = (nt * 16 * tb * 4
            + 2 * tb * 128 * x_itemsize
            + 2 * 24 * tb * 4
            + 4 * 1024 * 1024)
    try:
        cap = int(pltpu.get_tpu_info().vmem_capacity_bytes)
    except Exception:
        cap = 64 * 1024 * 1024          # conservative (v7x-sized) fallback
    return max(32 * 1024 * 1024, min(need, int(cap * 0.85)))


def nested_model_forward(x, w1, b1, w2, b2, w3, b3, *, tb=2048, stream_bf16=False):
    """x: (B, 100) f32.  Weights in PyTorch nn.Linear layout: w (out, in), b (out,).

    tb: batch tile size (multiple of 128).  Default 2048: at these tiny model
    dims the kernel is per-grid-step-overhead bound for small tiles, and a
    100x2048 f32 x tile is still <1 MB of double-buffered VMEM.
    """
    B, F = x.shape
    assert F == 100, F
    assert tb % 128 == 0, tb

    TB = min(tb, _round_up(B, 128))
    B_pad = _round_up(B, TB)
    NT = B_pad // TB

    if B_pad != B:
        # Batch-axis zero pad only (no transpose); elided whenever TB divides B.
        x = jnp.pad(x, ((0, B_pad - B), (0, 0)))

    if stream_bf16:
        # Opt-in: halve the dominant HBM stream and use the bf16-native MXU;
        # accumulation stays f32 (preferred_element_type).
        x_in, w1_in = x.astype(jnp.bfloat16), w1.astype(jnp.bfloat16)
    else:
        x_in, w1_in = x, w1

    b1c, b2c, b3c = b1[:, None], b2[:, None], b3[:, None]

    const = lambda p, i: (0, 0)               # weights/biases: VMEM-resident
    # Pass 0 streams x tiles; pass 1 holds the last-fetched block (no refetch).
    x_map = lambda p, i: (i * (1 - p) + p * (NT - 1), 0)

    grid_spec = pltpu.PrefetchScalarGridSpec(
        num_scalar_prefetch=0,
        grid=(2, NT),
        in_specs=[
            pl.BlockSpec((TB, 100), x_map),    # x (batch-major, lane dim = 100)
            pl.BlockSpec((200, 100), const),   # W1
            pl.BlockSpec((200, 1), const),     # b1
            pl.BlockSpec((10, 200), const),    # W2
            pl.BlockSpec((10, 1), const),      # b2
            pl.BlockSpec((20, 10), const),     # W3
            pl.BlockSpec((20, 1), const),      # b3
        ],
        # Output written only in pass 1; in pass 0 the index stays at block 0
        # so no stale write-back ever lands after a real one.
        out_specs=pl.BlockSpec((20, TB), lambda p, i: (0, i * p)),
        scratch_shapes=[
            pltpu.VMEM((NT, 10, TB), jnp.float32),   # staged exp(z - m_i)
            pltpu.VMEM((NT, 10, 1), jnp.float32),    # per-tile running max m_i
            pltpu.VMEM((10, 1), jnp.float32),        # global running max
            pltpu.VMEM((10, 1), jnp.float32),        # global running sum-exp
        ],
    )

    flops = 2 * B_pad * (100 * 200 + 200 * 10 + 10 * 20)
    bytes_accessed = (x_in.dtype.itemsize * B_pad * 100
                      + 4 * (B_pad * 20 + 200 * 100 + 200 + 10 * 200 + 10
                             + 20 * 10 + 20))

    outT = pl.pallas_call(
        _make_kernel(B, TB, NT),
        grid_spec=grid_spec,
        out_shape=jax.ShapeDtypeStruct((20, B_pad), jnp.float32),
        compiler_params=pltpu.CompilerParams(
            # Both axes carry the sequential batch-softmax reduction and the
            # shared VMEM scratch, so neither may be megacore-parallel (see
            # TODO at top for the v7x two-core restructure).
            dimension_semantics=("arbitrary", "arbitrary"),
            vmem_limit_bytes=_vmem_limit_bytes(NT, TB, x_in.dtype.itemsize),
        ),
        cost_estimate=pl.CostEstimate(
            flops=flops,
            transcendentals=B_pad * 10,
            bytes_accessed=bytes_accessed,
        ),
    )(x_in, w1_in, b1c, w2, b2c, w3, b3c)

    return outT.T[:B]


def init_params(key):
    """Deterministic init mirroring nn.Linear shapes in PyTorch (out, in) layout."""
    ks = jax.random.split(key, 6)

    def u(k, shape, fan_in):
        bound = 1.0 / jnp.sqrt(fan_in)
        return jax.random.uniform(k, shape, jnp.float32, -bound, bound)

    w1 = u(ks[0], (200, 100), 100)   # BaseModel.linear1
    b1 = u(ks[1], (200,), 100)
    w2 = u(ks[2], (10, 200), 200)    # BaseModel.linear2
    b2 = u(ks[3], (10,), 200)
    w3 = u(ks[4], (20, 10), 10)      # NestedModel.linear1
    b3 = u(ks[5], (20,), 10)
    return w1, b1, w2, b2, w3, b3


def reference_forward(x, w1, b1, w2, b2, w3, b3):
    h = jnp.maximum(x @ w1.T + b1, 0.0)
    z = h @ w2.T + b2
    s = jax.nn.softmax(z, axis=0)            # dim=0 softmax, like the PyTorch module
    return jnp.maximum(s @ w3.T + b3, 0.0)


if __name__ == "__main__":
    key = jax.random.PRNGKey(0)
    kx, kp = jax.random.split(key)
    B = 300   # deliberately NOT a multiple of 128 -> exercises padding/masking
    x = jax.random.normal(kx, (B, 100), jnp.float32)
    params = init_params(kp)
    ref = reference_forward(x, *params)

    # Multi-tile path: TB=128 -> 3 batch tiles, two passes.
    out = jax.block_until_ready(nested_model_forward(x, *params, tb=128))
    assert out.shape == (B, 20), out.shape
    assert jnp.allclose(out, ref, atol=2e-4, rtol=2e-3), \
        float(jnp.max(jnp.abs(out - ref)))

    # Single-tile path (default large tile size).
    out2 = jax.block_until_ready(nested_model_forward(x, *params))
    assert jnp.allclose(out2, ref, atol=2e-4, rtol=2e-3), \
        float(jnp.max(jnp.abs(out2 - ref)))

    # Opt-in bf16 streaming of x / W1 (f32 accumulation); looser tolerance.
    out3 = jax.block_until_ready(nested_model_forward(x, *params, stream_bf16=True))
    assert jnp.allclose(out3, ref, atol=1e-2, rtol=5e-2), \
        float(jnp.max(jnp.abs(out3 - ref)))

    print("KERNEL_OK")
</pallas_src>

<mosaic_0001>
module attributes {stable_mosaic.version = 11 : i64} {
  func.func @kernel(%arg0: i32, %arg1: i32, %arg2: memref<128x100xf32, #tpu.memory_space<vmem>>, %arg3: memref<200x100xf32, #tpu.memory_space<vmem>>, %arg4: memref<200x1xf32, #tpu.memory_space<vmem>>, %arg5: memref<10x200xf32, #tpu.memory_space<vmem>>, %arg6: memref<10x1xf32, #tpu.memory_space<vmem>>, %arg7: memref<20x10xf32, #tpu.memory_space<vmem>>, %arg8: memref<20x1xf32, #tpu.memory_space<vmem>>, %arg9: memref<20x128xf32, #tpu.memory_space<vmem>>, %arg10: memref<3x10x128xf32, #tpu.memory_space<vmem>>, %arg11: memref<3x10x1xf32, #tpu.memory_space<vmem>>, %arg12: memref<10x1xf32, #tpu.memory_space<vmem>>, %arg13: memref<10x1xf32, #tpu.memory_space<vmem>>) attributes {dimension_semantics = [#tpu.dimension_semantics<arbitrary>, #tpu.dimension_semantics<arbitrary>], iteration_bounds = array<i64: 2, 3>, scalar_prefetch = 0 : i64, scratch_operands = 4 : i64, tpu.core_type = #tpu.core_type<tc>, window_params = [{transform_indices = @transform_0, window_bounds = array<i64: 128, 100>}, {pipeline_mode = #tpu.pipeline_mode<synchronous>, transform_indices = @transform_1, window_bounds = array<i64: 200, 100>}, {pipeline_mode = #tpu.pipeline_mode<synchronous>, transform_indices = @transform_2, window_bounds = array<i64: 200, 1>}, {pipeline_mode = #tpu.pipeline_mode<synchronous>, transform_indices = @transform_3, window_bounds = array<i64: 10, 200>}, {pipeline_mode = #tpu.pipeline_mode<synchronous>, transform_indices = @transform_4, window_bounds = array<i64: 10, 1>}, {pipeline_mode = #tpu.pipeline_mode<synchronous>, transform_indices = @transform_5, window_bounds = array<i64: 20, 10>}, {pipeline_mode = #tpu.pipeline_mode<synchronous>, transform_indices = @transform_6, window_bounds = array<i64: 20, 1>}, {transform_indices = @transform_7, window_bounds = array<i64: 20, 128>}]} {
    %c0_i32 = arith.constant 0 : i32
    %0 = arith.cmpi eq, %arg0, %c0_i32 : i32
    %1 = arith.extui %0 : i1 to i32
    %c0_i32_0 = arith.constant 0 : i32
    %2 = arith.cmpi ne, %1, %c0_i32_0 : i32
    scf.if %2 {
      %c0_i32_2 = arith.constant 0 : i32
      %6 = arith.cmpi eq, %arg1, %c0_i32_2 : i32
      %7 = arith.extui %6 : i1 to i32
      %c0_i32_3 = arith.constant 0 : i32
      %8 = arith.cmpi ne, %7, %c0_i32_3 : i32
      scf.if %8 {
        %cst_18 = arith.constant -3.40282347E+38 : f32
        %28 = vector.broadcast %cst_18 : f32 to vector<10x1xf32>
        %c0_19 = arith.constant 0 : index
        %c0_20 = arith.constant 0 : index
        %29 = vector.load %arg12[%c0_19, %c0_20] : memref<10x1xf32, #tpu.memory_space<vmem>>, vector<10x1xf32>
        tpu.vector_store %arg12[%c0_19, %c0_20], %28 {strides = array<i32>} : memref<10x1xf32, #tpu.memory_space<vmem>>, vector<10x1xf32>,
        %cst_21 = arith.constant 0.000000e+00 : f32
        %30 = vector.broadcast %cst_21 : f32 to vector<10x1xf32>
        %c0_22 = arith.constant 0 : index
        %c0_23 = arith.constant 0 : index
        %31 = vector.load %arg13[%c0_22, %c0_23] : memref<10x1xf32, #tpu.memory_space<vmem>>, vector<10x1xf32>
        tpu.vector_store %arg13[%c0_22, %c0_23], %30 {strides = array<i32>} : memref<10x1xf32, #tpu.memory_space<vmem>>, vector<10x1xf32>,
      } else {
      }
      %c0 = arith.constant 0 : index
      %c0_4 = arith.constant 0 : index
      %9 = vector.load %arg3[%c0, %c0_4] : memref<200x100xf32, #tpu.memory_space<vmem>>, vector<200x100xf32>
      %c0_5 = arith.constant 0 : index
      %c0_6 = arith.constant 0 : index
      %10 = vector.load %arg2[%c0_5, %c0_6] : memref<128x100xf32, #tpu.memory_space<vmem>>, vector<128x100xf32>
      %cst = arith.constant dense<0.000000e+00> : vector<200x128xf32>
      %11 = tpu.matmul %9, %10, %cst {dimension_numbers = #tpu.dot_dimension_numbers<[1], [1], [0], [0], [0, 0, 1, 0], [], []>} : vector<200x100xf32>, vector<128x100xf32>, vector<200x128xf32> -> vector<200x128xf32>
      %c0_7 = arith.constant 0 : index
      %c0_8 = arith.constant 0 : index
      %12 = vector.load %arg4[%c0_7, %c0_8] : memref<200x1xf32, #tpu.memory_space<vmem>>, vector<200x1xf32>
      %13 = vector.broadcast %12 : vector<200x1xf32> to vector<200x128xf32>
      %14 = arith.addf %11, %13 : vector<200x128xf32>
      %cst_9 = arith.constant 0.000000e+00 : f32
      %15 = vector.broadcast %cst_9 : f32 to vector<200x128xf32>
      %16 = arith.maximumf %14, %15 : vector<200x128xf32>
      %c0_10 = arith.constant 0 : index
      %c0_11 = arith.constant 0 : index
      %17 = vector.load %arg5[%c0_10, %c0_11] : memref<10x200xf32, #tpu.memory_space<vmem>>, vector<10x200xf32>
      %cst_12 = arith.constant dense<0.000000e+00> : vector<10x128xf32>
      %18 = tpu.matmul %17, %16, %cst_12 {dimension_numbers = #tpu.dot_dimension_numbers<[1], [0], [0], [1], [0, 0, 1, 1], [], []>} : vector<10x200xf32>, vector<200x128xf32>, vector<10x128xf32> -> vector<10x128xf32>
      %c0_13 = arith.constant 0 : index
      %c0_14 = arith.constant 0 : index
      %19 = vector.load %arg6[%c0_13, %c0_14] : memref<10x1xf32, #tpu.memory_space<vmem>>, vector<10x1xf32>
      %20 = vector.broadcast %19 : vector<10x1xf32> to vector<10x128xf32>
      %21 = arith.addf %18, %20 : vector<10x128xf32>
      %c2_i32 = arith.constant 2 : i32
      %22 = arith.cmpi ne, %arg1, %c2_i32 : i32
      %23 = arith.extui %22 : i1 to i32
      %c0_i32_15 = arith.constant 0 : i32
      %24 = arith.cmpi ne, %23, %c0_i32_15 : i32
      scf.if %24 {
        %c0_18 = arith.constant 0 : index
        %c0_19 = arith.constant 0 : index
        %28 = vector.load %arg12[%c0_18, %c0_19] : memref<10x1xf32, #tpu.memory_space<vmem>>, vector<10x1xf32>
        %cst_20 = arith.constant dense<0xFF800000> : vector<10xf32>
        %29 = vector.multi_reduction <maximumf>, %21, %cst_20 [1] : vector<10x128xf32> to vector<10xf32>
        %30 = vector.shape_cast %29 : vector<10xf32> to vector<10x1xf32>
        %31 = arith.maximumf %28, %30 : vector<10x1xf32>
        %32 = vector.broadcast %31 : vector<10x1xf32> to vector<10x128xf32>
        %33 = arith.subf %21, %32 : vector<10x128xf32>
        %34 = math.exp %33 : vector<10x128xf32>
        %35 = arith.index_cast %arg1 : i32 to index
        %c0_21 = arith.constant 0 : index
        %c0_22 = arith.constant 0 : index
        %36 = vector.load %arg10[%35, %c0_21, %c0_22] : memref<3x10x128xf32, #tpu.memory_space<vmem>>, vector<1x10x128xf32>
        %37 = vector.shape_cast %36 : vector<1x10x128xf32> to vector<10x128xf32>
        %38 = vector.shape_cast %34 : vector<10x128xf32> to vector<1x10x128xf32>
        tpu.vector_store %arg10[%35, %c0_21, %c0_22], %38 {strides = array<i32>} : memref<3x10x128xf32, #tpu.memory_space<vmem>>, vector<1x10x128xf32>,
        %39 = arith.index_cast %arg1 : i32 to index
        %c0_23 = arith.constant 0 : index
        %c0_24 = arith.constant 0 : index
        %40 = vector.load %arg11[%39, %c0_23, %c0_24] : memref<3x10x1xf32, #tpu.memory_space<vmem>>, vector<1x10x1xf32>
        %41 = vector.shape_cast %40 : vector<1x10x1xf32> to vector<10x1xf32>
        %42 = vector.shape_cast %31 : vector<10x1xf32> to vector<1x10x1xf32>
        tpu.vector_store %arg11[%39, %c0_23, %c0_24], %42 {strides = array<i32>} : memref<3x10x1xf32, #tpu.memory_space<vmem>>, vector<1x10x1xf32>,
        %43 = arith.subf %28, %31 : vector<10x1xf32>
        %44 = math.exp %43 : vector<10x1xf32>
        %c0_25 = arith.constant 0 : index
        %c0_26 = arith.constant 0 : index
        %45 = vector.load %arg13[%c0_25, %c0_26] : memref<10x1xf32, #tpu.memory_space<vmem>>, vector<10x1xf32>
        %46 = arith.mulf %44, %45 : vector<10x1xf32>
        %cst_27 = arith.constant dense<0.000000e+00> : vector<10xf32>
        %47 = vector.multi_reduction <add>, %34, %cst_27 [1] : vector<10x128xf32> to vector<10xf32>
        %48 = vector.shape_cast %47 : vector<10xf32> to vector<10x1xf32>
        %49 = arith.addf %46, %48 : vector<10x1xf32>
        %c0_28 = arith.constant 0 : index
        %c0_29 = arith.constant 0 : index
        %50 = vector.load %arg13[%c0_28, %c0_29] : memref<10x1xf32, #tpu.memory_space<vmem>>, vector<10x1xf32>
        tpu.vector_store %arg13[%c0_28, %c0_29], %49 {strides = array<i32>} : memref<10x1xf32, #tpu.memory_space<vmem>>, vector<10x1xf32>,
        %c0_30 = arith.constant 0 : index
        %c0_31 = arith.constant 0 : index
        %51 = vector.load %arg12[%c0_30, %c0_31] : memref<10x1xf32, #tpu.memory_space<vmem>>, vector<10x1xf32>
        tpu.vector_store %arg12[%c0_30, %c0_31], %31 {strides = array<i32>} : memref<10x1xf32, #tpu.memory_space<vmem>>, vector<10x1xf32>,
      } else {
      }
      %c2_i32_16 = arith.constant 2 : i32
      %25 = arith.cmpi eq, %arg1, %c2_i32_16 : i32
      %26 = arith.extui %25 : i1 to i32
      %c0_i32_17 = arith.constant 0 : i32
      %27 = arith.cmpi ne, %26, %c0_i32_17 : i32
      scf.if %27 {
        %28 = tpu.iota {dimensions = array<i32: 1>} : vector<10x128xi32>
        %c44_i32 = arith.constant 44 : i32
        %29 = vector.broadcast %c44_i32 : i32 to vector<10x128xi32>
        %30 = arith.cmpi slt, %28, %29 : vector<10x128xi32>
        %cst_18 = arith.constant -3.40282347E+38 : f32
        %31 = vector.broadcast %cst_18 : f32 to vector<10x128xf32>
        %32 = arith.select %30, %21, %31 : vector<10x128xi1>, vector<10x128xf32>
        %c0_19 = arith.constant 0 : index
        %c0_20 = arith.constant 0 : index
        %33 = vector.load %arg12[%c0_19, %c0_20] : memref<10x1xf32, #tpu.memory_space<vmem>>, vector<10x1xf32>
        %cst_21 = arith.constant dense<0xFF800000> : vector<10xf32>
        %34 = vector.multi_reduction <maximumf>, %32, %cst_21 [1] : vector<10x128xf32> to vector<10xf32>
        %35 = vector.shape_cast %34 : vector<10xf32> to vector<10x1xf32>
        %36 = arith.maximumf %33, %35 : vector<10x1xf32>
        %37 = vector.broadcast %36 : vector<10x1xf32> to vector<10x128xf32>
        %38 = arith.subf %32, %37 : vector<10x128xf32>
        %39 = math.exp %38 : vector<10x128xf32>
        %40 = arith.index_cast %arg1 : i32 to index
        %c0_22 = arith.constant 0 : index
        %c0_23 = arith.constant 0 : index
        %41 = vector.load %arg10[%40, %c0_22, %c0_23] : memref<3x10x128xf32, #tpu.memory_space<vmem>>, vector<1x10x128xf32>
        %42 = vector.shape_cast %41 : vector<1x10x128xf32> to vector<10x128xf32>
        %43 = vector.shape_cast %39 : vector<10x128xf32> to vector<1x10x128xf32>
        tpu.vector_store %arg10[%40, %c0_22, %c0_23], %43 {strides = array<i32>} : memref<3x10x128xf32, #tpu.memory_space<vmem>>, vector<1x10x128xf32>,
        %44 = arith.index_cast %arg1 : i32 to index
        %c0_24 = arith.constant 0 : index
        %c0_25 = arith.constant 0 : index
        %45 = vector.load %arg11[%44, %c0_24, %c0_25] : memref<3x10x1xf32, #tpu.memory_space<vmem>>, vector<1x10x1xf32>
        %46 = vector.shape_cast %45 : vector<1x10x1xf32> to vector<10x1xf32>
        %47 = vector.shape_cast %36 : vector<10x1xf32> to vector<1x10x1xf32>
        tpu.vector_store %arg11[%44, %c0_24, %c0_25], %47 {strides = array<i32>} : memref<3x10x1xf32, #tpu.memory_space<vmem>>, vector<1x10x1xf32>,
        %48 = arith.subf %33, %36 : vector<10x1xf32>
        %49 = math.exp %48 : vector<10x1xf32>
        %c0_26 = arith.constant 0 : index
        %c0_27 = arith.constant 0 : index
        %50 = vector.load %arg13[%c0_26, %c0_27] : memref<10x1xf32, #tpu.memory_space<vmem>>, vector<10x1xf32>
        %51 = arith.mulf %49, %50 : vector<10x1xf32>
        %cst_28 = arith.constant dense<0.000000e+00> : vector<10xf32>
        %52 = vector.multi_reduction <add>, %39, %cst_28 [1] : vector<10x128xf32> to vector<10xf32>
        %53 = vector.shape_cast %52 : vector<10xf32> to vector<10x1xf32>
        %54 = arith.addf %51, %53 : vector<10x1xf32>
        %c0_29 = arith.constant 0 : index
        %c0_30 = arith.constant 0 : index
        %55 = vector.load %arg13[%c0_29, %c0_30] : memref<10x1xf32, #tpu.memory_space<vmem>>, vector<10x1xf32>
        tpu.vector_store %arg13[%c0_29, %c0_30], %54 {strides = array<i32>} : memref<10x1xf32, #tpu.memory_space<vmem>>, vector<10x1xf32>,
        %c0_31 = arith.constant 0 : index
        %c0_32 = arith.constant 0 : index
        %56 = vector.load %arg12[%c0_31, %c0_32] : memref<10x1xf32, #tpu.memory_space<vmem>>, vector<10x1xf32>
        tpu.vector_store %arg12[%c0_31, %c0_32], %36 {strides = array<i32>} : memref<10x1xf32, #tpu.memory_space<vmem>>, vector<10x1xf32>,
      } else {
      }
    } else {
    }
    %c1_i32 = arith.constant 1 : i32
    %3 = arith.cmpi eq, %arg0, %c1_i32 : i32
    %4 = arith.extui %3 : i1 to i32
    %c0_i32_1 = arith.constant 0 : i32
    %5 = arith.cmpi ne, %4, %c0_i32_1 : i32
    scf.if %5 {
      %6 = arith.index_cast %arg1 : i32 to index
      %c0 = arith.constant 0 : index
      %c0_2 = arith.constant 0 : index
      %7 = vector.load %arg10[%6, %c0, %c0_2] : memref<3x10x128xf32, #tpu.memory_space<vmem>>, vector<1x10x128xf32>
      %8 = vector.shape_cast %7 : vector<1x10x128xf32> to vector<10x128xf32>
      %9 = arith.index_cast %arg1 : i32 to index
      %c0_3 = arith.constant 0 : index
      %c0_4 = arith.constant 0 : index
      %10 = vector.load %arg11[%9, %c0_3, %c0_4] : memref<3x10x1xf32, #tpu.memory_space<vmem>>, vector<1x10x1xf32>
      %11 = vector.shape_cast %10 : vector<1x10x1xf32> to vector<10x1xf32>
      %c0_5 = arith.constant 0 : index
      %c0_6 = arith.constant 0 : index
      %12 = vector.load %arg12[%c0_5, %c0_6] : memref<10x1xf32, #tpu.memory_space<vmem>>, vector<10x1xf32>
      %13 = arith.subf %11, %12 : vector<10x1xf32>
      %14 = math.exp %13 : vector<10x1xf32>
      %c0_7 = arith.constant 0 : index
      %c0_8 = arith.constant 0 : index
      %15 = vector.load %arg13[%c0_7, %c0_8] : memref<10x1xf32, #tpu.memory_space<vmem>>, vector<10x1xf32>
      %16 = arith.divf %14, %15 : vector<10x1xf32>
      %17 = vector.broadcast %16 : vector<10x1xf32> to vector<10x128xf32>
      %18 = arith.mulf %8, %17 : vector<10x128xf32>
      %c0_9 = arith.constant 0 : index
      %c0_10 = arith.constant 0 : index
      %19 = vector.load %arg7[%c0_9, %c0_10] : memref<20x10xf32, #tpu.memory_space<vmem>>, vector<20x10xf32>
      %cst = arith.constant dense<0.000000e+00> : vector<20x128xf32>
      %20 = tpu.matmul %19, %18, %cst {dimension_numbers = #tpu.dot_dimension_numbers<[1], [0], [0], [1], [0, 0, 1, 1], [], []>} : vector<20x10xf32>, vector<10x128xf32>, vector<20x128xf32> -> vector<20x128xf32>
      %c0_11 = arith.constant 0 : index
      %c0_12 = arith.constant 0 : index
      %21 = vector.load %arg8[%c0_11, %c0_12] : memref<20x1xf32, #tpu.memory_space<vmem>>, vector<20x1xf32>
      %22 = vector.broadcast %21 : vector<20x1xf32> to vector<20x128xf32>
      %23 = arith.addf %20, %22 : vector<20x128xf32>
      %cst_13 = arith.constant 0.000000e+00 : f32
      %24 = vector.broadcast %cst_13 : f32 to vector<20x128xf32>
      %25 = arith.maximumf %23, %24 : vector<20x128xf32>
      %c0_14 = arith.constant 0 : index
      %c0_15 = arith.constant 0 : index
      %26 = vector.load %arg9[%c0_14, %c0_15] : memref<20x128xf32, #tpu.memory_space<vmem>>, vector<20x128xf32>
      tpu.vector_store %arg9[%c0_14, %c0_15], %25 {strides = array<i32>} : memref<20x128xf32, #tpu.memory_space<vmem>>, vector<20x128xf32>,
    } else {
    }
    return
  }
  func.func @transform_0(%arg0: i32, %arg1: i32) -> (i32, i32) {
    %c1_i32 = arith.constant 1 : i32
    %0 = arith.subi %c1_i32, %arg0 : i32
    %1 = arith.muli %arg1, %0 : i32
    %c2_i32 = arith.constant 2 : i32
    %2 = arith.muli %arg0, %c2_i32 : i32
    %3 = arith.addi %1, %2 : i32
    %c0_i32 = arith.constant 0 : i32
    %c0_i32_0 = arith.constant 0 : i32
    return %3, %c0_i32 : i32, i32
  }
  func.func @transform_1(%arg0: i32, %arg1: i32) -> (i32, i32) {
    %c0_i32 = arith.constant 0 : i32
    %c0_i32_0 = arith.constant 0 : i32
    %c0_i32_1 = arith.constant 0 : i32
    return %c0_i32, %c0_i32_0 : i32, i32
  }
  func.func @transform_2(%arg0: i32, %arg1: i32) -> (i32, i32) {
    %c0_i32 = arith.constant 0 : i32
    %c0_i32_0 = arith.constant 0 : i32
    %c0_i32_1 = arith.constant 0 : i32
    return %c0_i32, %c0_i32_0 : i32, i32
  }
  func.func @transform_3(%arg0: i32, %arg1: i32) -> (i32, i32) {
    %c0_i32 = arith.constant 0 : i32
    %c0_i32_0 = arith.constant 0 : i32
    %c0_i32_1 = arith.constant 0 : i32
    return %c0_i32, %c0_i32_0 : i32, i32
  }
  func.func @transform_4(%arg0: i32, %arg1: i32) -> (i32, i32) {
    %c0_i32 = arith.constant 0 : i32
    %c0_i32_0 = arith.constant 0 : i32
    %c0_i32_1 = arith.constant 0 : i32
    return %c0_i32, %c0_i32_0 : i32, i32
  }
  func.func @transform_5(%arg0: i32, %arg1: i32) -> (i32, i32) {
    %c0_i32 = arith.constant 0 : i32
    %c0_i32_0 = arith.constant 0 : i32
    %c0_i32_1 = arith.constant 0 : i32
    return %c0_i32, %c0_i32_0 : i32, i32
  }
  func.func @transform_6(%arg0: i32, %arg1: i32) -> (i32, i32) {
    %c0_i32 = arith.constant 0 : i32
    %c0_i32_0 = arith.constant 0 : i32
    %c0_i32_1 = arith.constant 0 : i32
    return %c0_i32, %c0_i32_0 : i32, i32
  }
  func.func @transform_7(%arg0: i32, %arg1: i32) -> (i32, i32) {
    %0 = arith.muli %arg1, %arg0 : i32
    %c0_i32 = arith.constant 0 : i32
    %c0_i32_0 = arith.constant 0 : i32
    return %c0_i32, %0 : i32, i32
  }
}

</mosaic_0001>

<bundles_post_ra>
// kernel: tpu_custom_call.1
= control target key start
LH: loop header
LB: loop body
LE: loop exit
PB: predicated region body
PF: predicated region fallthrough
CT: control target
= control target key end

     0   :  { %12 = vsyncpa [#allocation7], 0  ;;  %s2409_s0 = inlined_call_operand.vmem [shape: f32[384,100], index: 0, kind: input, shape index: {}]   ;;  %s2410_s1 = inlined_call_operand.vmem [shape: f32[200,100], index: 1, kind: input, shape index: {}]   ;;  %s2411_s2 = inlined_call_operand.vmem [shape: f32[200,1], index: 2, kind: input, shape index: {}]   ;;  %s2412_s3 = inlined_call_operand.vmem [shape: f32[10,200], index: 3, kind: input, shape index: {}]   ;;  %s2413_s4 = inlined_call_operand.vmem [shape: f32[10,1], index: 4, kind: input, shape index: {}]   ;;  %s2414_s5 = inlined_call_operand.vmem [shape: f32[20,10], index: 5, kind: input, shape index: {}]   ;;  %s2415_s6 = inlined_call_operand.vmem [shape: f32[20,1], index: 6, kind: input, shape index: {}]   ;;  %s2416_s7 = inlined_call_operand.hbm [shape: f32[20,384], index: 7, kind: output, shape index: {}]  }
   0x1   :  { %14 = vsyncpa [#allocation7 + $0x1], 0  ;;  %s1849_s24 = smov 0   ;;  %s1851_s25 = smov 0  }
   0x2   :  { %s1853_s26 = smov 0   ;;  %s1855_s27 = smov 0  }
   0x3   :  { %s1857_s28 = smov 0   ;;  %s1859_s29 = smov 0  }
   0x4   :  { %s1861_s30 = smov 0   ;;  %s1863_s8 = smov 0  }
   0x5 LB: > { %s1346_s9 = sadd.s32 4294967295, %s1793_s8   ;;  %s1347_s10 = sadd.s32 4294967294, %s1793_s8   ;;  %s1793_s8 = sphi %s1863_s8, %s20_s8   ;;  %s1789_s30 = sphi %s1861_s30, %s2431_s30   ;;  %s1785_s29 = sphi %s1859_s29, %s2430_s29   ;;  %s1781_s28 = sphi %s1857_s28, %s2429_s28   ;;  %s1777_s27 = sphi %s1855_s27, %s2428_s27   ;;  %s1773_s26 = sphi %s1853_s26, %s2427_s26   ;;  %s1769_s25 = sphi %s1851_s25, %s2426_s25   ;;  %s1765_s24 = sphi %s1849_s24, %s2425_s24  }
   0x6   : > { %s29_s11 = sadd.s32 1, %s1785_s29  ;;  %s32_s12 = sadd.s32 1, %s1789_s30 }
   0x7   : > { %p30_p0 = scmp.ge.s32.totalorder %s29_s11, 3  ;;  %s196_s13 = smul.u32 %s1785_s29, %s1789_s30 }
   0x8   : > { %p211_p1 = scmp.ne.s32.totalorder %s1773_s26, %s1769_s25  ;;  %p212_p2 = scmp.eq.s32.totalorder %s1346_s9, 5 }
   0x9   : > { %s2433_s11 = smov (%p30_p0, %s29_s11), 0  ;;  %s2435_s12 = smov (!%p30_p0, %s32_s12), %s1789_s30 }
   0xa   : > { %2419 = sst [smem:[#allocation9_spill]] %s2433_s11  ;;  %p217_p3 = scmp.ne.s32.totalorder %s1769_s25, %s1765_s24 }
   0xb   : > { %p34_p4 = scmp.ge.s32.totalorder %s2435_s12, 2  ;;  %p218_p5 = scmp.eq.s32.totalorder %s1347_s10, 5 }
   0xc   : > { %p1902_p6 = por %p212_p2, %p211_p1  ;;  %p1352_p7 = scmp.ge.s32.totalorder %s1793_s8, 1 }
   0xd   : > { %s2437_s12 = smov (%p34_p4, %s2435_s12), 0  ;;  %p1909_p8 = por %p218_p5, %p217_p3 }
   0xe   : > { %2421 = sst [smem:[#allocation10_spill]] %s2437_s12  ;;  %p271_p9 = scmp.lt.s32.totalorder %s1793_s8, 7 }
   0xf   : > { %s197_s16 = smul.u32 %s2437_s12, %s2433_s11  ;;  %s201_s18 = sadd.s32 1, %s1773_s26 }
  0x10   : > { %p272_p10 = pnand %p1352_p7, %p271_p9 }
  0x11   : > { %s198_s17 = ssub.s32 %s196_s13, %s197_s16  ;;  %s304_s20 = sand.u32 (!%p272_p10), 1, %s1769_s25  }
  0x12   : > { %p199_p11 = scmp.eq.s32.totalorder %s198_s17, 0  ;;  %275 = sbr.rel (%p272_p10) target bundleno = 1870 (0x74e), region = 48 }
  0x13   : > { %s307_s21 = ssub.s32 (!%p272_p10), 1, %s1781_s28  ;;  %s1584_s22 = smul.u32 (!%p272_p10), 24, %s304_s20 }
  0x14   : > { %s1918_s19 = scalar_select %p199_p11, %s1773_s26, %s201_s18  }
  0x15   : > { %s1353_s23 = sshll.u32 (!%p272_p10), %s1781_s28, 1  ;;  %s308_s9 = smul.u32 (!%p272_p10), %s1777_s27, %s307_s21 }
  0x16   : > { %s1931_s11 = scalar_lea.vmem (!%p272_p10), [#allocation6], %s1584_s22  ;;  %p1356_p13 = scmp.ne.s32.totalorder (!%p272_p10), %s1781_s28, 0 }
  0x17   : > { %s310_s10 = sadd.s32 %s1353_s23, %s308_s9  ;;  %p1357_p0 = scmp.ne.s32.totalorder (!%p1356_p13), %s1777_s27, 0 }
  0x18   : > { %s1354_s12 = sshll.u32 %s310_s10, 4 }
  0x19   : > { %p312_p12 = scmp.lt.s32.totalorder %s1354_s12, 47  ;;  %325 = sbr.rel (%p1356_p13) target bundleno = 1482 (0x5ca), region = 52 }
  0x1b   : > { %s2439_s12 = smov (!%p312_p12, %s1354_s12), 47 }
  0x1c   : > { %s1355_s13 = sshll.u32 %s2439_s12, 3 }
  0x1d   : > { %s1929_s18 = scalar_lea.vmem %s2409_s0, %s1355_s13 }
  0x1e   : > { %329 = sbr.rel (%p1357_p0) target bundleno = 38 (0x26), region = 56 }
  0x23   : > { %vm330_vm0 = vcmask 7168   ;;  %vm332_vm1 = vcmask 1024   ;;  %v1795_v0 = vmov -3.4028235e+38   ;;  %v1796_v1 = vmov 0.0  }
  0x24   : > { %331 = vst.msk [vmem:[#allocation4] sm:$0xff] %vm330_vm0, %v1795_v0  ;;  %334 = vst.msk [vmem:[#allocation5] sm:$0xff] %vm330_vm0, %v1796_v1 }
  0x25   : > { %333 = vst.msk [vmem:[#allocation4 + $0x8] sm:$0x3] %vm332_vm1, %v1795_v0  ;;  %335 = vst.msk [vmem:[#allocation5 + $0x8] sm:$0x3] %vm332_vm1, %v1796_v1 }
  0x26 PF: > { %v376_v2 = vld [vmem:[%s1929_s18 + $0x78] sm:$0xff]  ;;  %vm527_vm2 = vcmask 818176   ;;  %v1797_v3 = vmov 0.0   ;;  %vm1798_vm3 = vmmov 0   ;;  %v1799_v4 = vmov 0   ;;  %v375_v5 = vld [vmem:[%s1929_s18 + $0x70] sm:$0xff] }
  0x27   : > { %1460 = vmatprep.subr.mxu0 %v1797_v3  ;;  %1492 = vmatprep.mubr.msk.f32.mxu0 %vm1798_vm3, %v1797_v3  ;;  %v374_v6 = vld [vmem:[%s1929_s18 + $0x68] sm:$0xff]  ;;  %v392_v8 = vld [vmem:[%s2411_s2 + $0x78] sm:$0xff]  ;;  %v373_v9 = vld [vmem:[%s1929_s18 + $0x60] sm:$0xff]  ;;  %vm882_vm4 = vcmask 588800   ;;  %p1401_p1 = scmp.eq.s32.totalorder %s1777_s27, 2 }
  0x28   : > { %1461 = vmatpush3.xpose.msk.msra.mxu0 %vm527_vm2, %v376_v2  ;;  %1670 = vset.pattern.permute.xlu1 %v1799_v4  ;;  %v390_v7 = vld [vmem:[%s2411_s2 + $0x68] sm:$0xff]  ;;  %v389_v10 = vld [vmem:[%s2411_s2 + $0x60] sm:$0xff]  ;;  %v391_v11 = vld [vmem:[%s2411_s2 + $0x70] sm:$0xff]  ;;  %s1402_s16 = sshll.u32 (!%p1401_p1), %s1777_s27, 4 }
  0x29   : > { %1462 = vmatprep.subr.mxu0 %v1797_v3  ;;  %1669 = vset.pattern.permute.xlu0 %v1799_v4  ;;  %v372_v12 = vld [vmem:[%s1929_s18 + $0x58] sm:$0xff]  ;;  %v387_v13 = vld [vmem:[%s2411_s2 + $0x50] sm:$0xff]  ;;  %v385_v16 = vld [vmem:[%s2411_s2 + $0x40] sm:$0xff]  ;;  %s998_s17 = scalar_lea.vmem (!%p1401_p1), [#allocation3], %s1402_s16  ;;  %s995_s12 = scalar_lea.vmem (!%p1401_p1), [#allocation2], %s1402_s16 }
  0x2a   : > { %889 = vmatprep.subr.mxu1 %v1797_v3  ;;  %469 = vperm.xlu1 %1670, %v390_v7   ;;  %v388_v14 = vld [vmem:[%s2411_s2 + $0x58] sm:$0xff]  ;;  %v371_v15 = vld [vmem:[%s1929_s18 + $0x50] sm:$0xff]  ;;  %v386_v17 = vld [vmem:[%s2411_s2 + $0x48] sm:$0xff] }
  0x2b   : > { %479 = vperm.xlu0 %1669, %v392_v8   ;;  %v370_v18 = vld [vmem:[%s1929_s18 + $0x48] sm:$0xff]  ;;  %v383_v19 = vld [vmem:[%s2411_s2 + $0x30] sm:$0xff]  ;;  %v384_v20 = vld [vmem:[%s2411_s2 + $0x38] sm:$0xff] }
  0x2c   : > { %1463 = vmatpush3.xpose.msk.msra.mxu0 %vm527_vm2, %v375_v5  ;;  %v369_v21 = vld [vmem:[%s1929_s18 + $0x40] sm:$0xff]  ;;  %v382_v23 = vld [vmem:[%s2411_s2 + $0x28] sm:$0xff]  ;;  %v368_v24 = vld [vmem:[%s1929_s18 + $0x38] sm:$0xff] }
  0x2d   : > { %1464 = vmatprep.subr.mxu0 %v1797_v3  ;;  %v381_v22 = vld [vmem:[%s2411_s2 + $0x20] sm:$0xff]  ;;  %v379_v25 = vld [vmem:[%s2411_s2 + $0x10] sm:$0xff]  ;;  %v380_v26 = vld [vmem:[%s2411_s2 + $0x18] sm:$0xff] }
  0x2e   : > { %464 = vperm.xlu1 %1670, %v389_v10   ;;  %v367_v27 = vld [vmem:[%s1929_s18 + $0x30] sm:$0xff]  ;;  %v377_v28 = vld [vmem:[%s2411_s2] sm:$0xff]  ;;  %v378_v29 = vld [vmem:[%s2411_s2 + $0x8] sm:$0xff] }
  0x2f   : > { %474 = vperm.xlu0 %1669, %v391_v11   ;;  %v366_v30 = vld [vmem:[%s1929_s18 + $0x28] sm:$0xff]  ;;  %v400_v31 = vld [vmem:[%s2411_s2 + $0xb8] sm:$0xff]  ;;  %v401_v32 = vld [vmem:[%s2411_s2 + $0xc0] sm:$0xff] }
  0x30   : > { %1465 = vmatpush3.xpose.msk.msra.mxu0 %vm527_vm2, %v374_v6  ;;  %v365_v33 = vld [vmem:[%s1929_s18 + $0x20] sm:$0xff]  ;;  %v398_v34 = vld [vmem:[%s2411_s2 + $0xa8] sm:$0xff]  ;;  %v399_v35 = vld [vmem:[%s2411_s2 + $0xb0] sm:$0xff] }
  0x31   : > { %1466 = vmatprep.subr.mxu0 %v1797_v3  ;;  %v364_v36 = vld [vmem:[%s1929_s18 + $0x18] sm:$0xff]  ;;  %v397_v38 = vld [vmem:[%s2411_s2 + $0xa0] sm:$0xff]  ;;  %v363_v39 = vld [vmem:[%s1929_s18 + $0x10] sm:$0xff] }
  0x32   : > { %454 = vperm.xlu1 %1670, %v387_v13   ;;  %v396_v37 = vld [vmem:[%s2411_s2 + $0x98] sm:$0xff]  ;;  %v394_v40 = vld [vmem:[%s2411_s2 + $0x88] sm:$0xff]  ;;  %v395_v41 = vld [vmem:[%s2411_s2 + $0x90] sm:$0xff] }
  0x33   : > { %459 = vperm.xlu0 %1669, %v388_v14   ;;  %v362_v42 = vld [vmem:[%s1929_s18 + $0x8] sm:$0xff]  ;;  %v870_v43 = vld [vmem:[%s2413_s4] sm:$0xff]  ;;  %v338_v49 = vld [vmem:[%s2410_s1 + $0x10] sm:$0xff] }
  0x34   : > { %1467 = vmatpush3.xpose.msk.msra.mxu0 %vm527_vm2, %v373_v9  ;;  %v393_v44 = vld [vmem:[%s2411_s2 + $0x80] sm:$0xff]  ;;  %v871_v46 = vld [vmem:[%s2413_s4 + $0x8] sm:$0x3]  ;;  %v339_v50 = vld [vmem:[%s2410_s1 + $0x18] sm:$0xff] }
  0x35   : > { %1468 = vmatprep.subr.mxu0 %v1797_v3  ;;  %v361_v45 = vld [vmem:[%s1929_s18] sm:$0xff]  ;;  %v337_v48 = vld [vmem:[%s2410_s1 + $0x8] sm:$0xff]  ;;  %v342_v53 = vld [vmem:[%s2410_s1 + $0x30] sm:$0xff] }
  0x36   : > { %444 = vperm.xlu1 %1670, %v385_v16   ;;  %v336_v47 = vld [vmem:[%s2410_s1] sm:$0xff]  ;;  %v341_v52 = vld [vmem:[%s2410_s1 + $0x28] sm:$0xff]  ;;  %v343_v54 = vld [vmem:[%s2410_s1 + $0x38] sm:$0xff] }
  0x37   : > { %449 = vperm.xlu0 %1669, %v386_v17   ;;  %v340_v51 = vld [vmem:[%s2410_s1 + $0x20] sm:$0xff]  ;;  %v345_v56 = vld [vmem:[%s2410_s1 + $0x48] sm:$0xff]  ;;  %v346_v57 = vld [vmem:[%s2410_s1 + $0x50] sm:$0xff] }
  0x38   : > { %1469 = vmatpush3.xpose.msk.msra.mxu0 %vm527_vm2, %v372_v12  ;;  %v344_v55 = vld [vmem:[%s2410_s1 + $0x40] sm:$0xff]  ;;  %v347_v58 = vld [vmem:[%s2410_s1 + $0x58] sm:$0xff]  ;;  %v349_v60 = vld [vmem:[%s2410_s1 + $0x68] sm:$0xff] }
  0x39   : > { %1470 = vmatprep.subr.mxu0 %v1797_v3  ;;  %v348_v59 = vld [vmem:[%s2410_s1 + $0x60] sm:$0xff]  ;;  %v350_v61 = vld [vmem:[%s2410_s1 + $0x70] sm:$0xff]  ;;  %v351_v62 = vld [vmem:[%s2410_s1 + $0x78] sm:$0xff] }
  0x3a   : > { %434 = vperm.xlu1 %1670, %v383_v19   ;;  %v352_v63 = vld [vmem:[%s2410_s1 + $0x80] sm:$0xff]  ;;  %v353_v0 = vld [vmem:[%s2410_s1 + $0x88] sm:$0xff]  ;;  %v354_v1 = vld [vmem:[%s2410_s1 + $0x90] sm:$0xff] }
  0x3b   : > { %439 = vperm.xlu0 %1669, %v384_v20   ;;  %v355_v2 = vld [vmem:[%s2410_s1 + $0x98] sm:$0xff]  ;;  %v356_v4 = vld [vmem:[%s2410_s1 + $0xa0] sm:$0xff]  ;;  %v357_v5 = vld [vmem:[%s2410_s1 + $0xa8] sm:$0xff] }
  0x3c   : > { %1471 = vmatpush3.xpose.msk.msra.mxu0 %vm527_vm2, %v371_v15  ;;  %v358_v6 = vld [vmem:[%s2410_s1 + $0xb0] sm:$0xff]  ;;  %v359_v7 = vld [vmem:[%s2410_s1 + $0xb8] sm:$0xff]  ;;  %v360_v8 = vld [vmem:[%s2410_s1 + $0xc0] sm:$0xff] }
  0x3d   : > { %1472 = vmatprep.subr.mxu0 %v1797_v3  ;;  %v867_v9 = vld [vmem:[%s2412_s3 + $0x8] sm:$0xff] }
  0x3e   : > { %424 = vperm.xlu1 %1670, %v381_v22   ;;  %1399 = vmatprep.mubr.msk.f32.mxu1 %vm882_vm4, %v867_v9 }
  0x3f   : > { %429 = vperm.xlu0 %1669, %v382_v23  }
  0x40   : > { %1473 = vmatpush3.xpose.msk.msra.mxu0 %vm527_vm2, %v370_v18 }
  0x41   : > { %1474 = vmatprep.subr.mxu0 %v1797_v3 }
  0x42   : > { %414 = vperm.xlu1 %1670, %v379_v25  }
  0x43   : > { %419 = vperm.xlu0 %1669, %v380_v26  }
  0x44   : > { %1475 = vmatpush3.xpose.msk.msra.mxu0 %vm527_vm2, %v369_v21 }
  0x45   : > { %1476 = vmatprep.subr.mxu0 %v1797_v3 }
  0x46   : > { %404 = vperm.xlu1 %1670, %v377_v28  }
  0x47   : > { %409 = vperm.xlu0 %1669, %v378_v29  }
  0x48   : > { %1477 = vmatpush3.xpose.msk.msra.mxu0 %vm527_vm2, %v368_v24 }
  0x49   : > { %1478 = vmatprep.subr.mxu0 %v1797_v3 }
  0x4a   : > { %519 = vperm.xlu1 %1670, %v400_v31  }
  0x4b   : > { %524 = vperm.xlu0 %1669, %v401_v32  }
  0x4c   : > { %1479 = vmatpush3.xpose.msk.msra.mxu0 %vm527_vm2, %v367_v27 }
  0x4d   : > { %1480 = vmatprep.subr.mxu0 %v1797_v3 }
  0x4e   : > { %509 = vperm.xlu1 %1670, %v398_v34  }
  0x4f   : > { %514 = vperm.xlu0 %1669, %v399_v35  }
  0x50   : > { %1481 = vmatpush3.xpose.msk.msra.mxu0 %vm527_vm2, %v366_v30 }
  0x51   : > { %1482 = vmatprep.subr.mxu0 %v1797_v3 }
  0x52   : > { %499 = vperm.xlu1 %1670, %v396_v37  }
  0x53   : > { %504 = vperm.xlu0 %1669, %v397_v38  }
  0x54   : > { %1483 = vmatpush3.xpose.msk.msra.mxu0 %vm527_vm2, %v365_v33 }
  0x55   : > { %1484 = vmatprep.subr.mxu0 %v1797_v3 }
  0x56   : > { %489 = vperm.xlu1 %1670, %v394_v40  }
  0x57   : > { %494 = vperm.xlu0 %1669, %v395_v41  }
  0x58   : > { %1485 = vmatpush3.xpose.msk.msra.mxu0 %vm527_vm2, %v364_v36 }
  0x59   : > { %1486 = vmatprep.subr.mxu0 %v1797_v3 }
  0x5a   : > { %874 = vperm.xlu1 %1670, %v870_v43  }
  0x5b   : > { %484 = vperm.xlu0 %1669, %v393_v44  }
  0x5c   : > { %1487 = vmatpush3.xpose.msk.msra.mxu0 %vm527_vm2, %v363_v39 }
  0x5d   : > { %1488 = vmatprep.subr.mxu0 %v1797_v3 }
  0x5f   : > { %879 = vperm.xlu0 %1669, %v871_v46  }
  0x60   : > { %1489 = vmatpush3.xpose.msk.msra.mxu0 %vm527_vm2, %v362_v42 }
  0x61   : > { %1490 = vmatprep.subr.mxu0 %v1797_v3 }
  0x64   : > { %1491 = vmatpush3.xpose.msk.msra.mxu0 %vm527_vm2, %v361_v45 }
  0x67   : > { %1493 = vmatmul.mubr.msk.f32.vlgmr.msra.gmra.mxu0 %vm527_vm2, %v336_v47 }
  0x68   : > { %1495 = vmatprep.mubr.msk.f32.mxu0 %vm1798_vm3, %v1797_v3 }
  0x6b   : > { %1496 = vmatmul.mubr.msk.f32.gmra.mxu0 %vm527_vm2, %v337_v48 }
  0x6c   : > { %1498 = vmatprep.mubr.msk.f32.mxu0 %vm1798_vm3, %v1797_v3 }
  0x6f   : > { %1499 = vmatmul.mubr.msk.f32.gmra.mxu0 %vm527_vm2, %v338_v49 }
  0x70   : > { %1501 = vmatprep.mubr.msk.f32.mxu0 %vm1798_vm3, %v1797_v3 }
  0x73   : > { %1502 = vmatmul.mubr.msk.f32.gmra.mxu0 %vm527_vm2, %v339_v50 }
  0x74   : > { %1504 = vmatprep.mubr.msk.f32.mxu0 %vm1798_vm3, %v1797_v3 }
  0x77   : > { %1505 = vmatmul.mubr.msk.f32.gmra.mxu0 %vm527_vm2, %v340_v51 }
  0x78   : > { %1507 = vmatprep.mubr.msk.f32.mxu0 %vm1798_vm3, %v1797_v3 }
  0x7b   : > { %1508 = vmatmul.mubr.msk.f32.gmra.mxu0 %vm527_vm2, %v341_v52 }
  0x7c   : > { %1510 = vmatprep.mubr.msk.f32.mxu0 %vm1798_vm3, %v1797_v3 }
  0x7f   : > { %1511 = vmatmul.mubr.msk.f32.gmra.mxu0 %vm527_vm2, %v342_v53 }
  0x80   : > { %1513 = vmatprep.mubr.msk.f32.mxu0 %vm1798_vm3, %v1797_v3 }
  0x83   : > { %1514 = vmatmul.mubr.msk.f32.gmra.mxu0 %vm527_vm2, %v343_v54 }
  0x84   : > { %1516 = vmatprep.mubr.msk.f32.mxu0 %vm1798_vm3, %v1797_v3 }
  0x87   : > { %1517 = vmatmul.mubr.msk.f32.gmra.mxu0 %vm527_vm2, %v344_v55 }
  0x88   : > { %1519 = vmatprep.mubr.msk.f32.mxu0 %vm1798_vm3, %v1797_v3 }
  0x8b   : > { %1520 = vmatmul.mubr.msk.f32.gmra.mxu0 %vm527_vm2, %v345_v56 }
  0x8c   : > { %1522 = vmatprep.mubr.msk.f32.mxu0 %vm1798_vm3, %v1797_v3 }
  0x8f   : > { %1523 = vmatmul.mubr.msk.f32.gmra.mxu0 %vm527_vm2, %v346_v57 }
  0x90   : > { %1525 = vmatprep.mubr.msk.f32.mxu0 %vm1798_vm3, %v1797_v3 }
  0x93   : > { %1526 = vmatmul.mubr.msk.f32.gmra.mxu0 %vm527_vm2, %v347_v58 }
  0x94   : > { %1528 = vmatprep.mubr.msk.f32.mxu0 %vm1798_vm3, %v1797_v3 }
  0x97   : > { %1529 = vmatmul.mubr.msk.f32.gmra.mxu0 %vm527_vm2, %v348_v59 }
  0x98   : > { %1531 = vmatprep.mubr.msk.f32.mxu0 %vm1798_vm3, %v1797_v3 }
  0x9b   : > { %1532 = vmatmul.mubr.msk.f32.gmra.mxu0 %vm527_vm2, %v349_v60 }
  0x9c   : > { %1534 = vmatprep.mubr.msk.f32.mxu0 %vm1798_vm3, %v1797_v3 }
  0x9f   : > { %1535 = vmatmul.mubr.msk.f32.gmra.mxu0 %vm527_vm2, %v350_v61 }
  0xa0   : > { %1537 = vmatprep.mubr.msk.f32.mxu0 %vm1798_vm3, %v1797_v3 }
  0xa3   : > { %1538 = vmatmul.mubr.msk.f32.gmra.mxu0 %vm527_vm2, %v351_v62 }
  0xa4   : > { %1540 = vmatprep.mubr.msk.f32.mxu0 %vm1798_vm3, %v1797_v3 }
  0xa5   : > { %v470_v33 = vpop.permute.xlu1 %469 }
  0xa6   : > { %v480_v30 = vpop.permute.xlu0 %479 }
  0xa7   : > { %1541 = vmatmul.mubr.msk.f32.gmra.mxu0 %vm527_vm2, %v352_v63 }
  0xa8   : > { %1543 = vmatprep.mubr.msk.f32.mxu0 %vm1798_vm3, %v1797_v3 }
  0xa9   : > { %v465_v38 = vpop.permute.xlu1 %464 }
  0xaa   : > { %v475_v35 = vpop.permute.xlu0 %474 }
  0xab   : > { %1544 = vmatmul.mubr.msk.f32.gmra.mxu0 %vm527_vm2, %v353_v0 }
  0xac   : > { %1546 = vmatprep.mubr.msk.f32.mxu0 %vm1798_vm3, %v1797_v3 }
  0xad   : > { %v455_v43 = vpop.permute.xlu1 %454 }
  0xae   : > { %v460_v40 = vpop.permute.xlu0 %459 }
  0xaf   : > { %1547 = vmatmul.mubr.msk.f32.gmra.mxu0 %vm527_vm2, %v354_v1 }
  0xb0   : > { %1549 = vmatprep.mubr.msk.f32.mxu0 %vm1798_vm3, %v1797_v3 }
  0xb1   : > { %v445_v48 = vpop.permute.xlu1 %444 }
  0xb2   : > { %v450_v45 = vpop.permute.xlu0 %449 }
  0xb3   : > { %1550 = vmatmul.mubr.msk.f32.gmra.mxu0 %vm527_vm2, %v355_v2 }
  0xb4   : > { %1552 = vmatprep.mubr.msk.f32.mxu0 %vm1798_vm3, %v1797_v3 }
  0xb5   : > { %v435_v59 = vpop.permute.xlu1 %434 }
  0xb6   : > { %v440_v54 = vpop.permute.xlu0 %439 }
  0xb7   : > { %1553 = vmatmul.mubr.msk.f32.gmra.mxu0 %vm527_vm2, %v356_v4 }
  0xb8   : > { %1555 = vmatprep.mubr.msk.f32.mxu0 %vm1798_vm3, %v1797_v3 }
  0xba   : > { %v430_v1 = vpop.permute.xlu0 %429 }
  0xbb   : > { %1556 = vmatmul.mubr.msk.f32.gmra.mxu0 %vm527_vm2, %v357_v5 }
  0xbc   : > { %1558 = vmatprep.mubr.msk.f32.mxu0 %vm1798_vm3, %v1797_v3 }
  0xbf   : > { %1559 = vmatmul.mubr.msk.f32.gmra.mxu0 %vm527_vm2, %v358_v6 }
  0xc0   : > { %1561 = vmatprep.mubr.msk.f32.mxu0 %vm1798_vm3, %v1797_v3 }
  0xc3   : > { %1562 = vmatmul.mubr.msk.f32.gmra.mxu0 %vm527_vm2, %v359_v7  ;;  %v425_v7 = vpop.permute.xlu1 %424 }
  0xc4   : > { %1564 = vmatprep.mubr.msk.f32.mxu0 %vm1798_vm3, %v1797_v3 }
  0xc7   : > { %1565 = vmatmul.mubr.msk.f32.gmra.mxu0 %vm527_vm2, %v360_v8 }
 0x127   : > { %v2219_v10 = vpop.f32.mrf.mxu0 }
 0x129   : > { %v1494_v11 = vpop.f32.mrf.mxu0 }
 0x12b   : > { %v2221_v12 = vpop.f32.mrf.mxu0 }
 0x12d   : > { %v1497_v13 = vpop.f32.mrf.mxu0 }
 0x12f   : > { %v2223_v14 = vpop.f32.mrf.mxu0 }
 0x131   : > { %v1500_v15 = vpop.f32.mrf.mxu0 }
 0x133   : > { %v2225_v16 = vpop.f32.mrf.mxu0 }
 0x135   : > { %v1503_v17 = vpop.f32.mrf.mxu0 }
 0x136   : > { %v420_v17 = vpop.permute.xlu0 %419 }
 0x137   : > { %v2227_v18 = vpop.f32.mrf.mxu0 }
 0x139   : > { %v1506_v19 = vpop.f32.mrf.mxu0 }
 0x13b   : > { %v2229_v20 = vpop.f32.mrf.mxu0 }
 0x13d   : > { %v1509_v21 = vpop.f32.mrf.mxu0 }
 0x13f   : > { %v2231_v22 = vpop.f32.mrf.mxu0 }
 0x140   : > { %v748_v21 = vadd.f32 %v2231_v22, %v435_v59  ;;  %v733_v22 = vadd.f32 %v2225_v16, %v420_v17 }
 0x141   : > { %v1512_v23 = vpop.f32.mrf.mxu0 }
 0x143   : > { %v752_v24 = vpop.f32.mrf.mxu0 }
 0x144   : > { %v753_v13 = vadd.f32 %v752_v24, %v440_v54 }
 0x145   : > { %v1515_v25 = vpop.f32.mrf.mxu0 }
 0x147   : > { %v757_v26 = vpop.f32.mrf.mxu0 }
 0x148   : > { %v758_v8 = vadd.f32 %v757_v26, %v445_v48  ;;  %v415_v26 = vpop.permute.xlu1 %414 }
 0x149   : > { %v1518_v27 = vpop.f32.mrf.mxu0 }
 0x14a   : > { %v849_v23 = vmax.f32 %v758_v8, 0.0  ;;  %v743_v27 = vadd.f32 %v2229_v20, %v430_v1 }
 0x14b   : > { %v762_v28 = vpop.f32.mrf.mxu0 }
 0x14c   : > { %v763_v4 = vadd.f32 %v762_v28, %v450_v45  ;;  %v848_v28 = vmax.f32 %v753_v13, 0.0  ;;  %v405_v20 = vpop.permute.xlu1 %404  ;;  %v868_v13 = vld [vmem:[%s2412_s3 + $0x10] sm:$0x3] }
 0x14d   : > { %v1521_v29 = vpop.f32.mrf.mxu0  ;;  %v718_v16 = vadd.f32 %v2219_v10, %v405_v20 }
 0x14e   : > { %v850_v15 = vmax.f32 %v763_v4, 0.0  ;;  %v738_v29 = vadd.f32 %v2227_v18, %v425_v7 }
 0x14f   : > { %v767_v31 = vpop.f32.mrf.mxu0 }
 0x150   : > { %v768_v63 = vadd.f32 %v767_v31, %v455_v43  ;;  %v410_v31 = vpop.permute.xlu0 %409 }
 0x151   : > { %v1524_v32 = vpop.f32.mrf.mxu0 }
 0x152   : > { %v851_v9 = vmax.f32 %v768_v63, 0.0 }
 0x153   : > { %v772_v34 = vpop.f32.mrf.mxu0 }
 0x154   : > { %v773_v60 = vadd.f32 %v772_v34, %v460_v40 }
 0x155   : > { %v1527_v36 = vpop.f32.mrf.mxu0 }
 0x156   : > { %v852_v5 = vmax.f32 %v773_v60, 0.0  ;;  %v845_v36 = vmax.f32 %v738_v29, 0.0 }
 0x157   : > { %v777_v37 = vpop.f32.mrf.mxu0 }
 0x158   : > { %v778_v56 = vadd.f32 %v777_v37, %v465_v38  ;;  %v525_v37 = vpop.permute.xlu0 %524  ;;  %v723_v38 = vadd.f32 %v2221_v12, %v410_v31  ;;  %v841_v12 = vmax.f32 %v718_v16, 0.0 }
 0x159   : > { %v1530_v39 = vpop.f32.mrf.mxu0 }
 0x15a   : > { %v853_v0 = vmax.f32 %v778_v56, 0.0  ;;  %v844_v39 = vmax.f32 %v733_v22, 0.0 }
 0x15b   : > { %v782_v41 = vpop.f32.mrf.mxu0 }
 0x15c   : > { %v783_v52 = vadd.f32 %v782_v41, %v470_v33  ;;  %v846_v33 = vmax.f32 %v743_v27, 0.0 }
 0x15d   : > { %v1533_v42 = vpop.f32.mrf.mxu0 }
 0x15e   : > { %v854_v61 = vmax.f32 %v783_v52, 0.0  ;;  %v520_v42 = vpop.permute.xlu1 %519 }
 0x15f   : > { %v787_v44 = vpop.f32.mrf.mxu0 }
 0x160   : > { %v788_v49 = vadd.f32 %v787_v44, %v475_v35  ;;  %v728_v35 = vadd.f32 %v2223_v14, %v415_v26  ;;  %v842_v14 = vmax.f32 %v723_v38, 0.0  ;;  %v515_v44 = vpop.permute.xlu0 %514 }
 0x161   : > { %v1536_v46 = vpop.f32.mrf.mxu0 }
 0x162   : > { %v855_v57 = vmax.f32 %v788_v49, 0.0  ;;  %v843_v41 = vmax.f32 %v728_v35, 0.0 }
 0x163   : > { %v792_v47 = vpop.f32.mrf.mxu0 }
 0x164   : > { %v793_v50 = vadd.f32 %v792_v47, %v480_v30  ;;  %v847_v30 = vmax.f32 %v748_v21, 0.0  ;;  %v510_v47 = vpop.permute.xlu1 %509 }
 0x165   : > { %v1539_v51 = vpop.f32.mrf.mxu0 }
 0x166   : > { %v856_v53 = vmax.f32 %v793_v50, 0.0  ;;  %v505_v50 = vpop.permute.xlu0 %504 }
 0x167   : > { %v2233_v55 = vpop.f32.mrf.mxu0 }
 0x168   : > { %890 = vmatpush1.msra.mxu1 %v856_v53 }
 0x169   : > { %v1542_v58 = vpop.f32.mrf.mxu0  ;;  %891 = vmatprep.subr.mxu1 %v1797_v3 }
 0x16a   : > { %892 = vmatpush1.msra.mxu1 %v855_v57  ;;  %v500_v57 = vpop.permute.xlu1 %499  ;;  %v495_v60 = vpop.permute.xlu0 %494 }
 0x16b   : > { %v2236_v62 = vpop.f32.mrf.mxu0  ;;  %893 = vmatprep.subr.mxu1 %v1797_v3 }
 0x16c   : > { %894 = vmatpush1.msra.mxu1 %v854_v61 }
 0x16d   : > { %v1545_v2 = vpop.f32.mrf.mxu0  ;;  %895 = vmatprep.subr.mxu1 %v1797_v3 }
 0x16e   : > { %896 = vmatpush1.msra.mxu1 %v853_v0  ;;  %v490_v2 = vpop.permute.xlu1 %489  ;;  %v485_v7 = vpop.permute.xlu0 %484 }
 0x16f   : > { %v2240_v6 = vpop.f32.mrf.mxu0  ;;  %897 = vmatprep.subr.mxu1 %v1797_v3  ;;  %v803_v4 = vadd.f32 %v2236_v62, %v490_v2  ;;  %v798_v8 = vadd.f32 %v2233_v55, %v485_v7  ;;  %v866_v62 = vld [vmem:[%s2412_s3] sm:$0xff]  ;;  %v869_v55 = vld [vmem:[%s2412_s3 + $0x18] sm:$0x3] }
 0x170   : > { %898 = vmatpush1.msra.mxu1 %v852_v5  ;;  %v808_v0 = vadd.f32 %v2240_v6, %v495_v60 }
 0x171   : > { %v1548_v11 = vpop.f32.mrf.mxu0  ;;  %899 = vmatprep.subr.mxu1 %v1797_v3  ;;  %v857_v6 = vmax.f32 %v798_v8, 0.0 }
 0x172   : > { %900 = vmatpush1.msra.mxu1 %v851_v9  ;;  %v859_v9 = vmax.f32 %v808_v0, 0.0  ;;  %v858_v11 = vmax.f32 %v803_v4, 0.0 }
 0x173   : > { %v2244_v19 = vpop.f32.mrf.mxu0  ;;  %901 = vmatprep.subr.mxu1 %v1797_v3 }
 0x174   : > { %902 = vmatpush1.msra.mxu1 %v850_v15  ;;  %v813_v61 = vadd.f32 %v2244_v19, %v500_v57  ;;  %v875_v15 = vpop.permute.xlu1 %874 }
 0x175   : > { %v1551_v25 = vpop.f32.mrf.mxu0  ;;  %903 = vmatprep.subr.mxu1 %v1797_v3 }
 0x176   : > { %904 = vmatpush1.msra.mxu1 %v849_v23  ;;  %v860_v5 = vmax.f32 %v813_v61, 0.0  ;;  %v880_v23 = vpop.permute.xlu0 %879 }
 0x177   : > { %v817_v24 = vpop.f32.mrf.mxu0  ;;  %905 = vmatprep.subr.mxu1 %v1797_v3 }
 0x178   : > { %906 = vmatpush1.msra.mxu1 %v848_v28  ;;  %v818_v58 = vadd.f32 %v817_v24, %v505_v50 }
 0x179   : > { %v1554_v32 = vpop.f32.mrf.mxu0  ;;  %907 = vmatprep.subr.mxu1 %v1797_v3 }
 0x17a   : > { %908 = vmatpush1.msra.mxu1 %v847_v30  ;;  %v861_v1 = vmax.f32 %v818_v58, 0.0 }
 0x17b   : > { %v822_v34 = vpop.f32.mrf.mxu0  ;;  %909 = vmatprep.subr.mxu1 %v1797_v3 }
 0x17c   : > { %910 = vmatpush1.msra.mxu1 %v846_v33  ;;  %v823_v54 = vadd.f32 %v822_v34, %v510_v47 }
 0x17d   : > { %v1557_v18 = vpop.f32.mrf.mxu0  ;;  %911 = vmatprep.subr.mxu1 %v1797_v3 }
 0x17e   : > { %912 = vmatpush1.msra.mxu1 %v845_v36  ;;  %v862_v63 = vmax.f32 %v823_v54, 0.0 }
 0x17f   : > { %v827_v40 = vpop.f32.mrf.mxu0  ;;  %913 = vmatprep.subr.mxu1 %v1797_v3 }
 0x180   : > { %914 = vmatpush1.msra.mxu1 %v844_v39  ;;  %v828_v52 = vadd.f32 %v827_v40, %v515_v44 }
 0x181   : > { %v1560_v43 = vpop.f32.mrf.mxu0  ;;  %915 = vmatprep.subr.mxu1 %v1797_v3 }
 0x182   : > { %916 = vmatpush1.msra.mxu1 %v843_v41  ;;  %v863_v59 = vmax.f32 %v828_v52, 0.0 }
 0x183   : > { %v832_v45 = vpop.f32.mrf.mxu0  ;;  %917 = vmatprep.subr.mxu1 %v1797_v3 }
 0x184   : > { %918 = vmatpush1.msra.mxu1 %v842_v14  ;;  %v833_v48 = vadd.f32 %v832_v45, %v520_v42 }
 0x185   : > { %v1563_v46 = vpop.f32.mrf.mxu0  ;;  %919 = vmatprep.subr.mxu1 %v1797_v3 }
 0x186   : > { %920 = vmatpush1.msra.mxu1 %v841_v12  ;;  %v864_v56 = vmax.f32 %v833_v48, 0.0 }
 0x187   : > { %v837_v10 = vpop.f32.mrf.mxu0  ;;  %935 = vmatprep.subr.mxu1 %v1797_v3 }
 0x188   : > { %v838_v49 = vadd.f32 %v837_v10, %v525_v37 }
 0x189   : > { %v1566_v51 = vpop.f32.mrf.mxu0 }
 0x18a   : > { %v865_v53 = vmax.f32 %v838_v49, 0.0 }
 0x18c   : > { %936 = vmatpush2.msra.mxu1 %v865_v53 }
 0x18d   : > { %937 = vmatprep.subr.mxu1 %v1797_v3 }
 0x18e   : > { %938 = vmatpush2.msra.mxu1 %v864_v56 }
 0x18f   : > { %939 = vmatprep.subr.mxu1 %v1797_v3 }
 0x190   : > { %940 = vmatpush2.msra.mxu1 %v863_v59 }
 0x191   : > { %941 = vmatprep.subr.mxu1 %v1797_v3 }
 0x192   : > { %942 = vmatpush2.msra.mxu1 %v862_v63 }
 0x193   : > { %943 = vmatprep.subr.mxu1 %v1797_v3 }
 0x194   : > { %944 = vmatpush2.msra.mxu1 %v861_v1 }
 0x195   : > { %945 = vmatprep.subr.mxu1 %v1797_v3 }
 0x196   : > { %946 = vmatpush2.msra.mxu1 %v860_v5 }
 0x197   : > { %947 = vmatprep.subr.mxu1 %v1797_v3 }
 0x198   : > { %948 = vmatpush2.msra.mxu1 %v859_v9 }
 0x199   : > { %949 = vmatprep.subr.mxu1 %v1797_v3 }
 0x19a   : > { %950 = vmatpush2.msra.mxu1 %v858_v11 }
 0x19b   : > { %951 = vmatprep.subr.mxu1 %v1797_v3 }
 0x19c   : > { %952 = vmatpush2.msra.mxu1 %v857_v6 }
 0x19d   : > { %954 = vmatmul.mubr.f32.vlgmr.msra.gmra.mxu1 %v866_v62 }
 0x19e   : > { %1400 = vmatprep.mubr.msk.f32.mxu1 %vm882_vm4, %v869_v55 }
 0x1a1   : > { %959 = vmatmul.mubr.f32.gmra.mxu1 %v868_v13 }
 0x25d   : > { %v955_v17 = vpop.f32.mrf.mxu1 }
 0x25e   : > { %v2286_v19 = vadd.f32 %v955_v17, %v875_v15 }
 0x25f   : > { %v957_v21 = vpop.f32.mrf.mxu1  ;;  %967 = sbr.rel (%p1401_p1) target bundleno = 1041 (0x411), region = 60 }
 0x261   : > { %v960_v3 = vpop.f32.mrf.mxu1 }
 0x262   : > { %v2288_v25 = vadd.f32 %v960_v3, %v880_v23 }
 0x263   : > { %v962_v26 = vpop.f32.mrf.mxu1 }
 0x264   : > { %vm972_vm5 = vcmask 1041408   ;;  %v1800_v28 = vmov 0   ;;  %v969_v24 = vld [vmem:[#allocation4 + $0x8] sm:$0x3]  ;;  %vm1001_vm6 = vcmask 1024   ;;  %v968_v31 = vld [vmem:[#allocation4] sm:$0xff] }
 0x265   : > { %v973_v27 = vsel %vm972_vm5, %v2288_v25, -inf  ;;  %1671 = vset.pattern.permute.xlu1 %v1800_v28  ;;  %1672 = vset.pattern.permute.xlu0 %v1800_v28  ;;  %vm999_vm7 = vcmask 7168   ;;  %v1010_v14 = vld [vmem:[#allocation5 + $0x8] sm:$0x3]  ;;  %v1009_v12 = vld [vmem:[#allocation5] sm:$0xff] }
 0x266   : > { %974 = vmax.xlane.f32.xlu0 %v973_v27 }
 0x26a   : > { %970 = vmax.xlane.f32.xlu0 %v2286_v19 }
 0x2ef   : > { %v975_v29 = vpop.xlane.xlu0 %974 }
 0x2f0   : > { %v977_v30 = vmax.f32 %v969_v24, %v975_v29 }
 0x2f2   : > { %1002 = vst.msk [vmem:[%s998_s17 + $0x8] sm:$0x3] %vm1001_vm6, %v977_v30  ;;  %v1004_v32 = vsub.f32 %v969_v24, %v977_v30  ;;  %1023 = vst.msk [vmem:[#allocation4 + $0x8] sm:$0x3] %vm1001_vm6, %v977_v30  ;;  %985 = vperm.xlu1 %1671, %v977_v30  }
 0x2f3   : > { %v971_v22 = vpop.xlane.xlu0 %970 }
 0x2f4   : > { %v976_v33 = vmax.f32 %v968_v31, %v971_v22  ;;  %v1007_v41 = vmul.f32 1.442695, %v1004_v32 }
 0x2f6   : > { %1000 = vst.msk [vmem:[%s998_s17] sm:$0xff] %vm999_vm7, %v976_v33  ;;  %v1003_v34 = vsub.f32 %v968_v31, %v976_v33  ;;  %1022 = vst.msk [vmem:[#allocation4] sm:$0xff] %vm999_vm7, %v976_v33  ;;  %980 = vperm.xlu1 %1671, %v976_v33  }
 0x2f8   : > { %v1005_v42 = vmul.f32 1.442695, %v1003_v34 }
 0x36d   : > { %v986_v20 = vpop.permute.xlu1 %985 }
 0x36e   : > { %v989_v35 = vsub.f32 %v2288_v25, %v986_v20 }
 0x370   : > { %v992_v36 = vmul.f32 1.442695, %v989_v35 }
 0x371   : > { %v981_v37 = vpop.permute.xlu1 %980 }
 0x372   : > { %1673 = vpow2.f32 %v992_v36  ;;  %v988_v18 = vsub.f32 %v2286_v19, %v981_v37 }
 0x374   : > { %v990_v38 = vmul.f32 1.442695, %v988_v18 }
 0x376   : > { %1675 = vpow2.f32 %v990_v38 }
 0x377   : > { %1677 = vpow2.f32 %v1007_v41 }
 0x378   : > { %1679 = vpow2.f32 %v1005_v42 }
 0x37f   : > { %v1674_v39 = vpop.eup %1673 }
 0x380   : > { %997 = vst [vmem:[%s995_s12 + $0x8] sm:$0x3] %v1674_v39  ;;  %v1015_v40 = vsel %vm972_vm5, %v1674_v39, 0.0 }
 0x381   : > { %1016 = vadd.xlane.f32.xlu1 %v1015_v40 }
 0x383   : > { %v1676_v16 = vpop.eup %1675 }
 0x384   : > { %996 = vst [vmem:[%s995_s12] sm:$0xff] %v1676_v16  ;;  %1013 = vadd.xlane.f32.xlu0 %v1676_v16  ;;  %v1678_v43 = vpop.eup %1677 }
 0x385   : > { %v1680_v44 = vpop.eup %1679  ;;  %v1012_v45 = vmul.f32 %v1678_v43, %v1010_v14 }
 0x386   : > { %v1011_v10 = vmul.f32 %v1680_v44, %v1009_v12 }
 0x40a   : > { %v1017_v46 = vpop.xlane.xlu1 %1016 }
 0x40b   : > { %v1019_v47 = vadd.f32 %v1017_v46, %v1012_v45 }
 0x40d   : > { %1021 = vst.msk [vmem:[#allocation5 + $0x8] sm:$0x3] %vm1001_vm6, %v1019_v47  ;;  %v1014_v48 = vpop.xlane.xlu0 %1013 }
 0x40e   : > { %v1018_v49 = vadd.f32 %v1014_v48, %v1011_v10 }
 0x410   : > { %1020 = vst.msk [vmem:[#allocation5] sm:$0xff] %vm999_vm7, %v1018_v49 }
 0x411 PF: > { %p1403_p2 = scmp.ne.s32.totalorder %s1777_s27, 2 }
 0x412   : > { %s1404_s21 = sshll.u32 (!%p1403_p2), %s1777_s27, 4 }
 0x413   : > { %1027 = sbr.rel (%p1403_p2) target bundleno = 1482 (0x5ca), region = 64  ;;  %s1063_s22 = scalar_lea.vmem (!%p1403_p2), [#allocation3], %s1404_s21 }
 0x414   : > { %s1060_s23 = scalar_lea.vmem (!%p1403_p2), [#allocation2], %s1404_s21 }
 0x418   : > { %v1028_v50 = vlaneseq  ;;  %vm1037_vm8 = vcmask 1041408   ;;  %v1801_v56 = vmov 0   ;;  %v1034_v57 = vld [vmem:[#allocation4 + $0x8] sm:$0x3]  ;;  %vm1066_vm10 = vcmask 1024   ;;  %v1033_v60 = vld [vmem:[#allocation4] sm:$0xff] }
 0x419   : > { %1681 = vset.pattern.permute.xlu1 %v1801_v56  ;;  %1682 = vset.pattern.permute.xlu0 %v1801_v56  ;;  %vm1064_vm11 = vcmask 7168   ;;  %v1075_v17 = vld [vmem:[#allocation5 + $0x8] sm:$0x3]  ;;  %v1074_v23 = vld [vmem:[#allocation5] sm:$0xff] }
 0x41a   : > { %v1029_v51 = vand.u32 127, %v1028_v50 }
 0x41c   : > { %vm1030_vm9 = vcmp.lt.s32.totalorder %v1029_v51, 44 }
 0x41d   : > { %v1032_v52 = vsel %vm1030_vm9, %v2288_v25, -3.4028235e+38  ;;  %v1031_v54 = vsel %vm1030_vm9, %v2286_v19, -3.4028235e+38 }
 0x41e   : > { %v1038_v53 = vsel %vm1037_vm8, %v1032_v52, -inf }
 0x41f   : > { %1039 = vmax.xlane.f32.xlu0 %v1038_v53 }
 0x423   : > { %1035 = vmax.xlane.f32.xlu0 %v1031_v54 }
 0x4a8   : > { %v1040_v58 = vpop.xlane.xlu0 %1039 }
 0x4a9   : > { %v1042_v59 = vmax.f32 %v1034_v57, %v1040_v58 }
 0x4ab   : > { %1067 = vst.msk [vmem:[%s1063_s22 + $0x8] sm:$0x3] %vm1066_vm10, %v1042_v59  ;;  %v1069_v61 = vsub.f32 %v1034_v57, %v1042_v59  ;;  %1088 = vst.msk [vmem:[#allocation4 + $0x8] sm:$0x3] %vm1066_vm10, %v1042_v59  ;;  %1050 = vperm.xlu1 %1681, %v1042_v59  }
 0x4ac   : > { %v1036_v63 = vpop.xlane.xlu0 %1035 }
 0x4ad   : > { %v1041_v0 = vmax.f32 %v1033_v60, %v1036_v63  ;;  %v1072_v55 = vmul.f32 1.442695, %v1069_v61 }
 0x4af   : > { %1065 = vst.msk [vmem:[%s1063_s22] sm:$0xff] %vm1064_vm11, %v1041_v0  ;;  %v1068_v1 = vsub.f32 %v1033_v60, %v1041_v0  ;;  %1087 = vst.msk [vmem:[#allocation4] sm:$0xff] %vm1064_vm11, %v1041_v0  ;;  %1045 = vperm.xlu1 %1681, %v1041_v0  }
 0x4b1   : > { %v1070_v13 = vmul.f32 1.442695, %v1068_v1 }
 0x526   : > { %v1051_v2 = vpop.permute.xlu1 %1050 }
 0x527   : > { %v1054_v4 = vsub.f32 %v1032_v52, %v1051_v2 }
 0x529   : > { %v1057_v5 = vmul.f32 1.442695, %v1054_v4 }
 0x52a   : > { %v1046_v7 = vpop.permute.xlu1 %1045 }
 0x52b   : > { %1683 = vpow2.f32 %v1057_v5  ;;  %v1053_v8 = vsub.f32 %v1031_v54, %v1046_v7 }
 0x52d   : > { %v1055_v9 = vmul.f32 1.442695, %v1053_v8 }
 0x52f   : > { %1685 = vpow2.f32 %v1055_v9 }
 0x530   : > { %1687 = vpow2.f32 %v1072_v55 }
 0x531   : > { %1689 = vpow2.f32 %v1070_v13 }
 0x538   : > { %v1684_v11 = vpop.eup %1683 }
 0x539   : > { %1062 = vst [vmem:[%s1060_s23 + $0x8] sm:$0x3] %v1684_v11  ;;  %v1080_v6 = vsel %vm1037_vm8, %v1684_v11, 0.0 }
 0x53a   : > { %1081 = vadd.xlane.f32.xlu1 %v1080_v6 }
 0x53c   : > { %v1686_v62 = vpop.eup %1685 }
 0x53d   : > { %1061 = vst [vmem:[%s1060_s23] sm:$0xff] %v1686_v62  ;;  %1078 = vadd.xlane.f32.xlu0 %v1686_v62  ;;  %v1688_v15 = vpop.eup %1687 }
 0x53e   : > { %v1690_v19 = vpop.eup %1689  ;;  %v1077_v21 = vmul.f32 %v1688_v15, %v1075_v17 }
 0x53f   : > { %v1076_v26 = vmul.f32 %v1690_v19, %v1074_v23 }
 0x5c3   : > { %v1082_v3 = vpop.xlane.xlu1 %1081 }
 0x5c4   : > { %v1084_v25 = vadd.f32 %v1082_v3, %v1077_v21 }
 0x5c6   : > { %1086 = vst.msk [vmem:[#allocation5 + $0x8] sm:$0x3] %vm1066_vm10, %v1084_v25  ;;  %v1079_v27 = vpop.xlane.xlu0 %1078 }
 0x5c7   : > { %v1083_v28 = vadd.f32 %v1079_v27, %v1076_v26 }
 0x5c9   : > { %1085 = vst.msk [vmem:[#allocation5] sm:$0xff] %vm1064_vm11, %v1083_v28 }
 0x5ca PF: > { %p1405_p3 = scmp.ne.s32.totalorder %s1781_s28, 1 }
 0x5cb   : > { %s1406_s18 = sshll.u32 (!%p1405_p3), %s1777_s27, 4 }
 0x5cc   : > { %1092 = sbr.rel (%p1405_p3) target bundleno = 1844 (0x734), region = 68  ;;  %s1097_s9 = scalar_lea.vmem (!%p1405_p3), [#allocation3], %s1406_s18 }
 0x5cd   : > { %s1094_s22 = scalar_lea.vmem (!%p1405_p3), [#allocation2], %s1406_s18 }
 0x5d1   : > { %v1101_v24 = vld [vmem:[#allocation4 + $0x8] sm:$0x3]  ;;  %v1802_v29 = vmov 0   ;;  %v1100_v30 = vld [vmem:[#allocation4] sm:$0xff]  ;;  %v1109_v32 = vld [vmem:[#allocation5 + $0x8] sm:$0x3] }
 0x5d2   : > { %1691 = vset.pattern.permute.xlu0 %v1802_v29  ;;  %1692 = vset.pattern.permute.xlu1 %v1802_v29  ;;  %v1099_v31 = vld [vmem:[%s1097_s9 + $0x8] sm:$0x3]  ;;  %v1098_v22 = vld [vmem:[%s1097_s9] sm:$0xff]  ;;  %v1108_v20 = vld [vmem:[#allocation5] sm:$0xff]  ;;  %1693 = vrcp.f32 %v1109_v32  ;;  %v1803_v39 = vmov 0.0   ;;  %vm1804_vm12 = vmmov 0  }
 0x5d3   : > { %v1103_v33 = vsub.f32 %v1099_v31, %v1101_v24  ;;  %v1102_v34 = vsub.f32 %v1098_v22, %v1100_v30  ;;  %1695 = vrcp.f32 %v1108_v20  ;;  %1567 = vmatprep.subr.mxu0 %v1803_v39  ;;  %1580 = vmatprep.subr.mxu1 %v1803_v39  ;;  %v1131_v42 = vld [vmem:[%s2415_s6 + $0x10] sm:$0xf]  ;;  %v1129_v43 = vld [vmem:[%s2415_s6] sm:$0xff]  ;;  %v1130_v14 = vld [vmem:[%s2415_s6 + $0x8] sm:$0xff]  ;;  %vm1157_vm13 = vcmask 1041408  }
 0x5d4   : > { %1571 = vmatprep.mubr.msk.f32.mxu0 %vm1804_vm12, %v1803_v39  ;;  %1574 = vmatprep.mubr.msk.f32.mxu1 %vm1804_vm12, %v1803_v39  ;;  %v1096_v44 = vld [vmem:[%s1094_s22 + $0x8] sm:$0x3]  ;;  %v1095_v46 = vld [vmem:[%s1094_s22] sm:$0xff]  ;;  %vm1147_vm14 = vcmask 80896   ;;  %v1128_v50 = vld [vmem:[%s2414_s5 + $0x10] sm:$0xf] }
 0x5d5   : > { %v1106_v35 = vmul.f32 1.442695, %v1103_v33  ;;  %v1104_v36 = vmul.f32 1.442695, %v1102_v34  ;;  %1134 = vperm.xlu1 %1692, %v1129_v43   ;;  %v1126_v48 = vld [vmem:[%s2414_s5] sm:$0xff]  ;;  %v1127_v49 = vld [vmem:[%s2414_s5 + $0x8] sm:$0xff] }
 0x5d7   : > { %1697 = vpow2.f32 %v1106_v35 }
 0x5d8   : > { %1699 = vpow2.f32 %v1104_v36 }
 0x5d9   : > { %1139 = vperm.xlu1 %1692, %v1130_v14  }
 0x5df   : > { %v1694_v37 = vpop.eup %1693 }
 0x5e0   : > { %v1696_v18 = vpop.eup %1695 }
 0x5e4   : > { %v1698_v38 = vpop.eup %1697 }
 0x5e5   : > { %v1700_v40 = vpop.eup %1699  ;;  %v1113_v16 = vmul.f32 %v1698_v38, %v1694_v37 }
 0x5e6   : > { %v1111_v41 = vmul.f32 %v1700_v40, %v1696_v18 }
 0x5e7   : > { %1121 = vperm.xlu0 %1691, %v1113_v16  }
 0x5eb   : > { %1116 = vperm.xlu0 %1691, %v1111_v41  }
 0x5ef   : > { %1144 = vperm.xlu0 %1691, %v1131_v42  }
 0x650   : > { %v1135_v51 = vpop.permute.xlu1 %1134 }
 0x654   : > { %v1140_v52 = vpop.permute.xlu1 %1139 }
 0x662   : > { %v1122_v45 = vpop.permute.xlu0 %1121 }
 0x663   : > { %v1125_v12 = vmul.f32 %v1122_v45, %v1096_v44 }
 0x665   : > { %1568 = vmatpush3.msk.msra.mxu0 %vm1157_vm13, %v1125_v12  ;;  %1582 = vmatpush3.msk.msra.mxu1 %vm1157_vm13, %v1125_v12 }
 0x666   : > { %v1117_v47 = vpop.permute.xlu0 %1116  ;;  %1569 = vmatprep.subr.mxu0 %v1803_v39  ;;  %1581 = vmatprep.subr.mxu1 %v1803_v39 }
 0x667   : > { %v1124_v10 = vmul.f32 %v1117_v47, %v1095_v46 }
 0x669   : > { %1570 = vmatpush3.msra.mxu0 %v1124_v10  ;;  %1583 = vmatpush3.msra.mxu1 %v1124_v10 }
 0x66a   : > { %1572 = vmatmul.mubr.msk.f32.vlgmr.msra.gmra.mxu0 %vm1147_vm14, %v1126_v48  ;;  %1575 = vmatmul.mubr.msk.f32.vlgmr.msra.gmra.mxu1 %vm1147_vm14, %v1127_v49  ;;  %v1145_v63 = vpop.permute.xlu0 %1144 }
 0x66b   : > { %1577 = vmatprep.mubr.msk.f32.mxu1 %vm1804_vm12, %v1803_v39 }
 0x66e   : > { %1578 = vmatmul.mubr.msk.f32.gmra.mxu1 %vm1147_vm14, %v1128_v50 }
 0x72a   : > { %v1227_v53 = vpop.f32.mrf.mxu0  ;;  %v1232_v54 = vpop.f32.mrf.mxu1 }
 0x72b   : > { %v1228_v56 = vadd.f32 %v1227_v53, %v1135_v51  ;;  %v1233_v57 = vadd.f32 %v1232_v54, %v1140_v52 }
 0x72c   : > { %v1576_v58 = vpop.f32.mrf.mxu1  ;;  %v1573_v59 = vpop.f32.mrf.mxu0 }
 0x72d   : > { %v1241_v60 = vmax.f32 %v1228_v56, 0.0  ;;  %v1242_v61 = vmax.f32 %v1233_v57, 0.0 }
 0x72e   : > { %v1237_v0 = vpop.f32.mrf.mxu1 }
 0x72f   : > { %1244 = vst [vmem:[%s1931_s11] sm:$0xff] %v1241_v60  ;;  %1245 = vst [vmem:[%s1931_s11 + $0x8] sm:$0xff] %v1242_v61  ;;  %v1238_v1 = vadd.f32 %v1237_v0, %v1145_v63 }
 0x730   : > { %v1579_v2 = vpop.f32.mrf.mxu1 }
 0x731   : > { %v1243_v4 = vmax.f32 %v1238_v1, 0.0 }
 0x733   : > { %1246 = vst [vmem:[%s1931_s11 + $0x10] sm:$0xf] %v1243_v4 }
 0x734 PF: > { %s1255_s17 = smul.u32 %s1777_s27, %s1781_s28  ;;  %s1261_s12 = sshll.u32 %s1931_s11, 4  ;;  %s2349_s12 = int_to_ptr.vmem [resolvable:$true] %s1261_s12 }
 0x735   : > { %s2358_s10 = scalar_lea.sflag [#allocation7], %s304_s20  ;;  %s1701_s13 = scalar_lea.vmem %s2349_s12, 384 }
 0x736   : > { %s1411_s21 = sshll.u32 %s1255_s17, 7  ;;  %p1702_p4 = scmp.ne.s32.totalorder %s2349_s12, %s1701_s13 }
 0x737   : > { %s2354_s9 = scalar_lea.hbm %s2416_s7, %s1411_s21  ;;  %s1805_s27 = smov [#allocation6]  }
 0x738   : > { %p1703_p5 = pnand %p1702_p4, %p1902_p6  ;;  %s1705_s28 = sshll.u32 %s1805_s27, 4  ;;  %s1706_s28 = int_to_ptr.vmem [resolvable:$false] %s1705_s28 }
 0x739   : > { %s1707_s11 = scalar_lea.vmem %s1706_s28, 768  ;;  %p1708_p9 = scmp.lt.s32.totalorder %s2349_s12, %s1706_s28 }
 0x73a   : > { %p1704_p7 = pneg %p1703_p5  ;;  %p1709_p10 = scmp.lt.s32.totalorder %s1707_s11, %s1701_s13 }
 0x73c   : > { %p1710_p11 = por %p1709_p10, %p1708_p9 }
 0x73e   : > { %p1711_p12 = pnand %p1710_p11, %p1704_p7 }
 0x740   : > { %1714 = shalt.err (!%p1711_p12)
}
 0x741   : > { %s1715_s20 = scalar_lea.hbm %s2354_s9, 384  ;;  %s1719_s17 = scalar_lea.hbm %s2416_s7, 1152 }
 0x742   : > { %p1716_p13 = scmp.ne.s32.totalorder %s2354_s9, %s1715_s20  ;;  %p1720_p2 = scmp.lt.s32.totalorder %s2354_s9, %s2416_s7 }
 0x743   : > { %p1721_p3 = scmp.lt.s32.totalorder %s1719_s17, %s1715_s20 }
 0x744   : > { %p1717_p0 = pnand %p1716_p13, %p1902_p6 }
 0x745   : > { %p1722_p4 = por %p1721_p3, %p1720_p2 }
 0x746   : > { %p1718_p1 = pneg %p1717_p0 }
 0x748   : > { %p1723_p5 = pnand %p1722_p4, %p1718_p1 }
 0x74a   : > { %1726 = shalt.err (!%p1723_p5)
}
 0x74b   : > { %s1806_s23 = smov 128   ;;  %s1807_s13 = smov 384  }
 0x74c   : > { %s1808_s27 = smov 8  }
 0x74d   : > { %1585 = dma.vmem_to_hbm [thread:$0]  (%p1902_p6), %s2349_s12, 384, %s2354_s9, %s2358_s10, %s1806_s23, %s1807_s13, %s1808_s27  }
 0x74e PF: > { %p1591_p7 = scmp.ge.s32.totalorder %s1793_s8, 2  ;;  %s1276_s28 = sand.u32 1, %s1765_s24  }
 0x74f   : > { %s1277_s11 = scalar_lea.sflag [#allocation7], %s1276_s28 }
 0x750   : > { %p1588_p9 = pnand %p1591_p7, %p1909_p8 }
 0x752   : > { %p1589_p10 = pneg %p1588_p9 }
 0x754   : > { %1760 = dma.done.wait (%p1589_p10), %s1277_s11, 384  }
 0x755   : > { %1762 = vsyncadd (%p1589_p10), %s1277_s11, 4294966912  ;;  %s20_s8 = sadd.s32 1, %s1793_s8   ;;  %s2423_s14 = sld [smem:[#allocation9_spill]] }
 0x756   : > { %p17_p11 = scmp.ge.s32.totalorder %s20_s8, 8   ;;  %s2424_s12 = sld [smem:[#allocation10_spill]] }
 0x757   : > { %s2425_s24 = smov %s1769_s25  ;;  %s2426_s25 = smov %s1773_s26 }
 0x758   : > { %s2427_s26 = smov %s1918_s19  ;;  %s2428_s27 = smov %s1785_s29 }
 0x759   : > { %s2429_s28 = smov %s1789_s30  ;;  %19 = sbr.rel (!%p17_p11) target bundleno = 5 (0x5), region = 109 }
 0x75b   : > { %s2430_s29 = smov %s2423_s14 }
 0x75c   : > { %s2431_s30 = smov %s2424_s12 }
 0x75e   :  { %1282 = vsyncpa [#allocation7], 1 }
 0x75f   :  { %1284 = vsyncpa [#allocation7 + $0x1], 1 }

</bundles_post_ra>
